<compile_context>
chip_gen: v7x
topology: tpu7x:2x2x1
jax: 0.10.0
libtpu: 0.0.40
codegen_flags: <defaults>
</compile_context>

<pallas_src>
import math
import functools

import jax
import jax.numpy as jnp
from jax.experimental import pallas as pl
from jax.experimental.pallas import tpu as pltpu


def make_positional_encoding_table(d_model: int, max_len: int = 500) -> jnp.ndarray:
    """Deterministic sin/cos table, matches the torch buffer `pe` ([1, max_len, d_model], f32)."""
    position = jnp.arange(max_len, dtype=jnp.float32)[:, None]                  # [max_len, 1]
    div_term = jnp.exp(jnp.arange(0, d_model, 2, dtype=jnp.float32)
                       * (-math.log(10000.0) / d_model))                        # [d_model/2]
    pe = jnp.zeros((max_len, d_model), dtype=jnp.float32)
    pe = pe.at[:, 0::2].set(jnp.sin(position * div_term))
    pe = pe.at[:, 1::2].set(jnp.cos(position * div_term))
    return pe[None]                                                             # [1, max_len, d_model]


# ----------------------------------- tiling heuristic ------------------------------------------

def _choose_tiles(num_rows: int, num_lanes: int, itemsize: int,
                  target_block_bytes: int = 2 * 1024 * 1024):
    """Pick (TB, TL) so each x block is ~target_block_bytes and both dims are tile-legal.

    Legality: second-minor (TB) must be a multiple of the sublane quantum OR the full
    extent; minor (TL) must be a multiple of 128 OR the full extent.  ~2 MiB blocks
    amortize the ~0.35us/step grid overhead at every HBM generation, give >=4 steps
    for any tensor >= 8 MiB (pipelining + v7x megacore sharding), and keep the total
    footprint (x + out double-buffered + pe) ~<= 10 MiB, under all scoped VMEM defaults.
    """
    itemsize = max(1, itemsize)
    sub = max(8, 32 // itemsize)               # 8 f32 / 16 bf16 / 32 int8 sublanes
    # Lane tile first: biggest multiple of 128 such that even a minimal (sub-row)
    # block stays under target.
    if num_lanes <= 128:
        tl = num_lanes                         # full extent: always legal
    else:
        cap = max(128, (target_block_bytes // (sub * itemsize)) // 128 * 128)
        tl = max(128, min((num_lanes // 128) * 128, cap))
    # Row tile: fill the remaining budget with sublane-aligned rows.
    if num_rows <= sub:
        tb = num_rows                          # full extent: always legal
    else:
        want = max(sub, (target_block_bytes // max(1, tl * itemsize)) // sub * sub)
        tb = max(sub, min((num_rows // sub) * sub, want))
    return tb, tl


# ----------------------------- eval-mode kernel (dropout = identity) ---------------------------

def _pe_add_kernel(x_ref, pe_ref, o_ref):
    # x_ref: (TB, TL) tile; pe_ref: (1, TL) f32 tile (broadcast over rows).
    o_ref[...] = (x_ref[...].astype(jnp.float32) + pe_ref[...]).astype(o_ref.dtype)


# ---------------------- training-mode kernel (inverted dropout, stateless hash) ----------------
# NOTE: the dropout mask is a valid Bernoulli(1-p) inverted dropout driven by a
# counter-based hash of (global element index, seed); it is not bit-identical to
# torch's RNG stream.

def _as_i32(v: int) -> int:
    v &= 0xFFFFFFFF
    return v - (1 << 32) if v >= (1 << 31) else v


_MIX_A = _as_i32(0x9E3779B9)   # golden-ratio / murmur-style odd constants
_MIX_B = _as_i32(0x85EBCA6B)
_MIX_C = _as_i32(0xC2B2AE35)
_MIX_D = _as_i32(0x7FEB352D)   # splitmix32 finalizer constants
_MIX_E = _as_i32(0x846CA68B)


def _logical_rshift_i32(v, n: int):
    # Logical right shift of an int32 tensor (mask out sign-extension bits).
    return (v >> n) & jnp.int32((1 << (32 - n)) - 1)


def _pe_add_dropout_kernel(seed_ref, x_ref, pe_ref, o_ref, *, p: float, tb: int, tl: int):
    y = x_ref[...].astype(jnp.float32) + pe_ref[...]          # (TB, TL) f32
    shape = y.shape

    # Global (row, col) element coordinates -> tiling-invariant, reproducible mask.
    rows = jax.lax.broadcasted_iota(jnp.int32, shape, 0) + pl.program_id(0) * tb
    cols = jax.lax.broadcasted_iota(jnp.int32, shape, 1) + pl.program_id(1) * tl
    seed = seed_ref[0]

    h = rows * jnp.int32(_MIX_A) + cols * jnp.int32(_MIX_B) + seed * jnp.int32(_MIX_C)
    h = h ^ _logical_rshift_i32(h, 16)
    h = h * jnp.int32(_MIX_D)
    h = h ^ _logical_rshift_i32(h, 15)
    h = h * jnp.int32(_MIX_E)
    h = h ^ _logical_rshift_i32(h, 16)

    low24 = h & jnp.int32(0x00FFFFFF)                          # uniform in [0, 2^24)
    thresh = jnp.int32(min(int(round(p * float(1 << 24))), (1 << 24) - 1))
    keep = low24 >= thresh                                     # drop prob = thresh / 2^24 ~= p

    scale = jnp.float32(1.0 / (1.0 - p))
    o_ref[...] = jnp.where(keep, y * scale, jnp.float32(0.0)).astype(o_ref.dtype)


# ------------------------------------------- wrapper --------------------------------------------

def positional_encoding_forward(x: jnp.ndarray,
                                pe_table: jnp.ndarray,
                                *,
                                dropout_p: float = 0.1,
                                training: bool = False,
                                seed: int = 0) -> jnp.ndarray:
    """x: [B, S, D]. pe_table: [1, max_len, D] (f32). Returns [B, S, D] (x.dtype)."""
    B, S, D = x.shape
    L = S * D
    itemsize = jnp.dtype(x.dtype).itemsize

    # Lane-dense 2-D views: x -> [B, S*D]; pe -> a single f32 row of period S*D.
    pe_row = pe_table[0, :S, :].astype(jnp.float32).reshape(1, L)
    x2 = x.reshape(B, L)

    TB, TL = _choose_tiles(B, L, itemsize)
    grid = (pl.cdiv(B, TB), pl.cdiv(L, TL))

    cparams = pltpu.CompilerParams(
        dimension_semantics=("parallel", "parallel"),   # both axes independent -> megacore OK
        vmem_limit_bytes=32 * 1024 * 1024,              # footprint sized ~<=10 MiB by the tiler
    )

    if (not training) or dropout_p == 0.0:
        out2 = pl.pallas_call(
            _pe_add_kernel,
            out_shape=jax.ShapeDtypeStruct((B, L), x.dtype),
            grid_spec=pltpu.PrefetchScalarGridSpec(
                num_scalar_prefetch=0,
                grid=grid,
                in_specs=[
                    pl.BlockSpec((TB, TL), lambda r, c: (r, c)),
                    pl.BlockSpec((1, TL), lambda r, c: (0, c)),
                ],
                out_specs=pl.BlockSpec((TB, TL), lambda r, c: (r, c)),
            ),
            compiler_params=cparams,
        )(x2, pe_row)
        return out2.reshape(B, S, D)

    # training mode: inverted dropout in-kernel
    assert 0.0 <= dropout_p < 1.0, "dropout_p must be in [0, 1) for the training path"
    seed_arr = jnp.asarray([seed], dtype=jnp.int32)
    kernel = functools.partial(_pe_add_dropout_kernel, p=float(dropout_p), tb=TB, tl=TL)
    out2 = pl.pallas_call(
        kernel,
        out_shape=jax.ShapeDtypeStruct((B, L), x.dtype),
        grid_spec=pltpu.PrefetchScalarGridSpec(
            num_scalar_prefetch=1,
            grid=grid,
            in_specs=[
                pl.BlockSpec((TB, TL), lambda r, c, seed: (r, c)),
                pl.BlockSpec((1, TL), lambda r, c, seed: (0, c)),
            ],
            out_specs=pl.BlockSpec((TB, TL), lambda r, c, seed: (r, c)),
        ),
        compiler_params=cparams,
    )(seed_arr, x2, pe_row)
    return out2.reshape(B, S, D)


if __name__ == "__main__":
    B, S, D = 2, 8, 32
    MAX_LEN = 500
    P = 0.1

    key = jax.random.PRNGKey(0)
    x = jax.random.normal(key, (B, S, D), dtype=jnp.float32)

    pe_table = make_positional_encoding_table(D, MAX_LEN)
    ref = x + pe_table[:, :S, :]

    # --- eval-mode forward (dropout is identity at inference) ---
    out = positional_encoding_forward(x, pe_table, dropout_p=P, training=False)
    out = jax.block_until_ready(out)
    assert out.shape == (B, S, D)
    assert jnp.allclose(out, ref, atol=1e-6), "eval-mode mismatch vs reference"

    # --- training-mode forward (inverted dropout) ---
    # TODO(synk): mask uses a counter-based hash, not torch's RNG stream (same Bernoulli semantics).
    out_tr = positional_encoding_forward(x, pe_table, dropout_p=P, training=True, seed=1234)
    out_tr = jax.block_until_ready(out_tr)
    assert out_tr.shape == (B, S, D)
    # every element is either dropped (0) or (x+pe) scaled by 1/(1-p)
    scaled = ref * jnp.float32(1.0 / (1.0 - P))
    ok = jnp.logical_or(out_tr == 0.0, jnp.isclose(out_tr, scaled, atol=1e-5, rtol=1e-5))
    assert bool(jnp.all(ok)), "training-mode dropout semantics mismatch"
    zero_frac = float(jnp.mean((out_tr == 0.0).astype(jnp.float32)))
    assert 0.0 < zero_frac < 0.5, f"implausible drop fraction {zero_frac}"

    print("KERNEL_OK")
</pallas_src>

<mosaic_0001>
module attributes {stable_mosaic.version = 11 : i64} {
  func.func @_pe_add_kernel(%arg0: i32, %arg1: i32, %arg2: memref<2x256xf32, #tpu.memory_space<vmem>>, %arg3: memref<1x256xf32, #tpu.memory_space<vmem>>, %arg4: memref<2x256xf32, #tpu.memory_space<vmem>>) attributes {dimension_semantics = [#tpu.dimension_semantics<parallel>, #tpu.dimension_semantics<parallel>], iteration_bounds = array<i64: 1, 1>, scalar_prefetch = 0 : i64, scratch_operands = 0 : i64, tpu.core_type = #tpu.core_type<tc>, window_params = [{transform_indices = @transform_0, window_bounds = array<i64: 2, 256>}, {transform_indices = @transform_1, window_bounds = array<i64: 1, 256>}, {transform_indices = @transform_2, window_bounds = array<i64: 2, 256>}]} {
    %c0 = arith.constant 0 : index
    %c0_0 = arith.constant 0 : index
    %0 = vector.load %arg2[%c0, %c0_0] : memref<2x256xf32, #tpu.memory_space<vmem>>, vector<2x256xf32>
    %c0_1 = arith.constant 0 : index
    %c0_2 = arith.constant 0 : index
    %1 = vector.load %arg3[%c0_1, %c0_2] : memref<1x256xf32, #tpu.memory_space<vmem>>, vector<1x256xf32>
    %2 = vector.broadcast %1 : vector<1x256xf32> to vector<2x256xf32>
    %3 = arith.addf %0, %2 : vector<2x256xf32>
    %c0_3 = arith.constant 0 : index
    %c0_4 = arith.constant 0 : index
    %4 = vector.load %arg4[%c0_3, %c0_4] : memref<2x256xf32, #tpu.memory_space<vmem>>, vector<2x256xf32>
    tpu.vector_store %arg4[%c0_3, %c0_4], %3 {strides = array<i32>} : memref<2x256xf32, #tpu.memory_space<vmem>>, vector<2x256xf32>,
    return
  }
  func.func @transform_0(%arg0: i32, %arg1: i32) -> (i32, i32) {
    %c0_i32 = arith.constant 0 : i32
    return %arg0, %arg1 : i32, i32
  }
  func.func @transform_1(%arg0: i32, %arg1: i32) -> (i32, i32) {
    %c0_i32 = arith.constant 0 : i32
    %c0_i32_0 = arith.constant 0 : i32
    return %c0_i32, %arg1 : i32, i32
  }
  func.func @transform_2(%arg0: i32, %arg1: i32) -> (i32, i32) {
    %c0_i32 = arith.constant 0 : i32
    return %arg0, %arg1 : i32, i32
  }
}

</mosaic_0001>

<bundles_post_ra>
// kernel: tpu_custom_call.1
= control target key start
LH: loop header
LB: loop body
LE: loop exit
PB: predicated region body
PF: predicated region fallthrough
CT: control target
= control target key end

     0   :  { %7 = vsyncpa [#allocation3], 0  ;;  %s157_s0 = inlined_call_operand.hbm [shape: f32[2,256], index: 0, kind: input, shape index: {}]   ;;  %s158_s1 = inlined_call_operand.vmem [shape: f32[1,256], index: 1, kind: input, shape index: {}]   ;;  %s159_s2 = inlined_call_operand.hbm [shape: f32[2,256], index: 2, kind: output, shape index: {}]  }
   0x1   :  { %8 = vsyncpa [#allocation4], 0  ;;  %s112_s9 = smov [#allocation2]   ;;  %s64_s13 = scalar_lea.hbm %s157_s0, 64 }
   0x2   :  { %s15_s10 = sshll.u32 %s112_s9, 4  ;;  %p65_p0 = scmp.ne.s32.totalorder %s157_s0, %s64_s13  ;;  %s16_s10 = int_to_ptr.vmem [resolvable:$true] %s15_s10 }
   0x3   :  { %p68_p1 = scmp.lt.u32.totalorder %s64_s13, %s157_s0 }
   0x5   :  { %p70_p2 = pnand %p68_p1, %p65_p0 }
   0x7   :  { %73 = shalt.err (!%p70_p2)
}
   0x8   :  { %s74_s18 = scalar_lea.vmem %s16_s10, 64  ;;  %p79_p4 = scmp.lt.s32.totalorder %s16_s10, %s16_s10 }
   0x9   :  { %p75_p3 = scmp.ne.s32.totalorder %s16_s10, %s74_s18  ;;  %p80_p5 = scmp.lt.s32.totalorder %s74_s18, %s74_s18 }
   0xb   :  { %p81_p6 = por %p80_p5, %p79_p4 }
   0xd   :  { %p82_p7 = pnand %p81_p6, %p75_p3 }
   0xf   :  { %85 = shalt.err (!%p82_p7)
}
  0x10   :  { %18 = dma.hbm_to_vmem [thread:$0]  %s157_s0, 64, %s16_s10, [#allocation3]  }
  0x11   :  { %108 = dma.done.wait [#allocation3], 64  }
  0x12   :  { %109 = vsyncadd [#allocation3], 4294967232  ;;  %v27_v0 = vlaneseq  ;;  %v113_v1 = vmov 1983009808   ;;  %v25_v7 = vld [vmem:[%s158_s1] sm:$0x3] }
  0x13   :  { %v37_v2 = vunpack.c.l.s4 %v113_v1  ;;  %v24_v12 = vld [vmem:[#allocation2] sm:$0xf]  ;;  %s114_s23 = smov [#allocation5]  }
  0x14   :  { %v28_v3 = vshrl.u32 %v27_v0, 7  ;;  %s52_s0 = sshll.u32 %s114_s23, 4  ;;  %s53_s0 = int_to_ptr.vmem [resolvable:$true] %s52_s0 }
  0x15   :  { %v38_v6 = vunpack.c.0.s8 %v37_v2  ;;  %s86_s24 = scalar_lea.vmem %s53_s0, 64  ;;  %p91_p9 = scmp.lt.s32.totalorder %s53_s0, %s53_s0 }
  0x16   :  { %v29_v4 = vsub.s32 0, %v28_v3  ;;  %v33_v5 = vsub.s32 1, %v28_v3  ;;  %p87_p8 = scmp.ne.s32.totalorder %s53_s0, %s86_s24  ;;  %p92_p10 = scmp.lt.s32.totalorder %s86_s24, %s86_s24 }
  0x17   :  { %v41_v10 = vsub.s32 %v38_v6, %v28_v3 }
  0x18   :  { %v30_v8 = vrot.slane %v25_v7, %v29_v4  ;;  %v34_v9 = vrot.slane %v25_v7, %v33_v5  ;;  %p93_p11 = por %p92_p10, %p91_p9 }
  0x1a   :  { %v35_v11 = vcombine.low %v30_v8, %v34_v9  ;;  %p94_p12 = pnand %p93_p11, %p87_p8 }
  0x1c   :  { %v42_v13 = vrot.slane %v35_v11, %v41_v10 }
  0x1e   :  { %v44_v14 = vadd.f32 %v42_v13, %v24_v12 }
  0x20   :  { %45 = vst [vmem:[#allocation5] sm:$0xf] %v44_v14 }
  0x21   :  { %97 = shalt.err (!%p94_p12)
}
  0x22   :  { %s98_s26 = scalar_lea.hbm %s159_s2, 64 }
  0x23   :  { %p99_p13 = scmp.ne.s32.totalorder %s159_s2, %s98_s26  ;;  %p102_p0 = scmp.lt.u32.totalorder %s98_s26, %s159_s2 }
  0x25   :  { %p104_p1 = pnand %p102_p0, %p99_p13 }
  0x27   :  { %107 = shalt.err (!%p104_p1)
}
  0x28   :  { %55 = dma.vmem_to_hbm [thread:$0]  %s53_s0, 64, %s159_s2, [#allocation4]  }
  0x29   :  { %110 = dma.done.wait [#allocation4], 64  }
  0x2a   :  { %111 = vsyncadd [#allocation4], 4294967232 }
  0x2b   :  { %59 = vsyncpa [#allocation3], 1 }
  0x2c   :  { %60 = vsyncpa [#allocation4], 1 }

</bundles_post_ra>
